<compile_context>
chip_gen: v7x
topology: tpu7x:2x2x1
jax: 0.10.0
libtpu: 0.0.40
codegen_flags: <defaults>
</compile_context>

<pallas_src>
import functools

import jax
import jax.numpy as jnp
from jax import lax
from jax.experimental import pallas as pl
from jax.experimental.pallas import tpu as pltpu

LRELU_SLOPE = 0.1


def get_padding(kernel_size, dilation=1):
    return (kernel_size * dilation - dilation) // 2


def _choose_time_tile(T, C, max_tile=2048):
    """Largest lane-friendly time tile that divides T (keeps VMEM bounded on v7x)."""
    if C > 512:
        max_tile = 1024
    if T <= max_tile:
        return T
    for tt in range(max_tile - (max_tile % 128), 127, -128):
        if T % tt == 0:
            return tt
    return T  # TODO(synk): ragged T — falls back to a single full-length block.


# -----------------------------------------------------------------------------
# Fused kernel: y1 = conv1(lrelu(x)) + b1 + x ; out = conv2(lrelu(y1)) + b2 + y1
# -----------------------------------------------------------------------------
def _resblock2_kernel(x_ref, halo_ref, w1_ref, b1_ref, w2_ref, b2_ref,
                      o_ref, xbuf, ybuf, *, K, d1, d2, T, TT, C, OFF):
    pad1 = ((K - 1) * d1) // 2
    pad2 = ((K - 1) * d2) // 2
    H = pad1 + pad2
    L1 = TT + 2 * pad2                 # stage-1 output width (tile + stage-2 halo)
    t = pl.program_id(1)

    # ---- assemble the halo'd input window in VMEM -------------------------
    # xbuf column (OFF + c) holds x[b, :, t*TT + c] for c in [-H, TT + H);
    # out-of-range columns arrive as zeros in the halo sidecar (== conv zero pad).
    hal = halo_ref[0, 0].astype(jnp.float32)                 # (C, 2H)
    xbuf[:, OFF - H:OFF] = hal[:, :H]
    xbuf[:, OFF + TT:OFF + TT + H] = hal[:, H:]
    xbuf[:, OFF:OFF + TT] = x_ref[0].astype(jnp.float32)     # lane-aligned bulk store

    # ---- stage 1: y1 over columns [-pad2, TT + pad2) -----------------------
    acc1 = jnp.broadcast_to(b1_ref[...], (C, L1))            # bias folded into init (f32)
    for k in range(K):                                       # static unrolled taps
        s = OFF - H + k * d1
        xk = xbuf[:, s:s + L1]
        xk = jnp.where(xk >= 0, xk, LRELU_SLOPE * xk)        # f32 leaky_relu per tap
        acc1 = acc1 + jnp.dot(w1_ref[k], xk.astype(jnp.bfloat16),
                              preferred_element_type=jnp.float32)
    y1 = acc1 + xbuf[:, OFF - pad2:OFF - pad2 + L1]          # residual in f32
    # zero y1 columns that fall outside [0, T): they act as conv2's zero padding.
    col = lax.broadcasted_iota(jnp.int32, (C, L1), 1) + (t * TT - pad2)
    y1 = jnp.where((col >= 0) & (col < T), y1, 0.0)
    ybuf[...] = y1                                           # intermediate stays in VMEM

    # ---- stage 2: out over the TT tile columns -----------------------------
    acc2 = jnp.broadcast_to(b2_ref[...], (C, TT))
    for k in range(K):
        yk = ybuf[:, k * d2:k * d2 + TT]
        yk = jnp.where(yk >= 0, yk, LRELU_SLOPE * yk)
        acc2 = acc2 + jnp.dot(w2_ref[k], yk.astype(jnp.bfloat16),
                              preferred_element_type=jnp.float32)
    o_ref[0] = (acc2 + ybuf[:, pad2:pad2 + TT]).astype(o_ref.dtype)


def res_block2_forward(x, params, kernel_size=3, dilation=(1, 3), time_tile=None):
    """Pallas implementation of ResBlock2.forward. params = [(w0, b0), (w1, b1)]."""
    assert len(params) == 2 and len(dilation) == 2
    B, C, T = x.shape
    K = kernel_size
    d1, d2 = dilation
    pad1, pad2 = get_padding(K, d1), get_padding(K, d2)
    H = pad1 + pad2
    (w1, b1), (w2, b2) = params

    TT = time_tile if time_tile is not None else _choose_time_tile(T, C)
    assert T % TT == 0 and TT >= 2 * H
    nT = T // TT
    OFF = 128                         # lane-aligned start of the interior inside xbuf

    # weights -> (K, C_out, C_in) in bf16 for the MXU; biases -> (C, 1) f32.
    w1k = jnp.transpose(w1, (2, 0, 1)).astype(jnp.bfloat16)
    w2k = jnp.transpose(w2, (2, 0, 1)).astype(jnp.bfloat16)
    b1c = b1.reshape(C, 1).astype(jnp.float32)
    b2c = b2.reshape(C, 1).astype(jnp.float32)

    # Tiny halo sidecar (B, nT, C, 2H): last/first H columns of the neighbouring
    # tiles (zeros at the sequence ends) — avoids a full padded copy of x in HBM.
    xr = x.reshape(B, C, nT, TT)
    zed = jnp.zeros((B, C, 1, H), x.dtype)
    left = jnp.concatenate([zed, xr[:, :, :-1, TT - H:]], axis=2)     # (B, C, nT, H)
    right = jnp.concatenate([xr[:, :, 1:, :H], zed], axis=2)          # (B, C, nT, H)
    halos = jnp.transpose(jnp.concatenate([left, right], axis=3), (0, 2, 1, 3))

    kernel = functools.partial(_resblock2_kernel, K=K, d1=d1, d2=d2,
                               T=T, TT=TT, C=C, OFF=OFF)

    # VMEM budget: double-buffered in/out blocks + bf16 weights + scratch (+ slack).
    est = (4 * C * TT * x.dtype.itemsize
           + 2 * 2 * K * C * C * 2
           + C * (OFF + TT + H) * 4 + C * (TT + 2 * pad2) * 4
           + (2 << 20))
    vmem_limit = int(min(max(est * 5 // 4, 32 * 1024 * 1024), 48 * 1024 * 1024))

    grid_spec = pltpu.PrefetchScalarGridSpec(
        num_scalar_prefetch=0,
        grid=(B, nT),
        in_specs=[
            pl.BlockSpec((1, C, TT), lambda b, t: (b, 0, t)),          # x tile
            pl.BlockSpec((1, 1, C, 2 * H), lambda b, t: (b, t, 0, 0)),  # halo sidecar
            pl.BlockSpec((K, C, C), lambda b, t: (0, 0, 0)),           # w1
            pl.BlockSpec((C, 1), lambda b, t: (0, 0)),                 # b1
            pl.BlockSpec((K, C, C), lambda b, t: (0, 0, 0)),           # w2
            pl.BlockSpec((C, 1), lambda b, t: (0, 0)),                 # b2
        ],
        out_specs=pl.BlockSpec((1, C, TT), lambda b, t: (b, 0, t)),
        scratch_shapes=[
            pltpu.VMEM((C, OFF + TT + H), jnp.float32),     # halo'd x window
            pltpu.VMEM((C, TT + 2 * pad2), jnp.float32),    # intermediate y1
        ],
    )
    return pl.pallas_call(
        kernel,
        out_shape=jax.ShapeDtypeStruct((B, C, T), x.dtype),
        grid_spec=grid_spec,
        compiler_params=pltpu.CompilerParams(
            dimension_semantics=("parallel", "parallel"),
            vmem_limit_bytes=vmem_limit),
    )(x, halos, w1k, b1c, w2k, b2c)


# -----------------------------------------------------------------------------
# Pure-JAX reference (f32) for correctness check
# -----------------------------------------------------------------------------
def res_block2_reference(x, params, kernel_size=3, dilation=(1, 3)):
    for (w, b), d in zip(params, dilation):
        pad = get_padding(kernel_size, d)
        xt = jnp.where(x >= 0, x, LRELU_SLOPE * x)
        y = lax.conv_general_dilated(
            xt, w, window_strides=(1,), padding=[(pad, pad)],
            rhs_dilation=(d,), dimension_numbers=("NCH", "OIH", "NCH"))
        x = y + b[None, :, None] + x
    return x


# Deterministic parameter init (mirrors init_weights: normal(0, 0.01), zero bias)
def init_params(key, channels, kernel_size=3, n_layers=2):
    params = []
    for _ in range(n_layers):
        key, wk = jax.random.split(key)
        w = 0.01 * jax.random.normal(wk, (channels, channels, kernel_size),
                                     dtype=jnp.float32)
        b = jnp.zeros((channels,), dtype=jnp.float32)
        params.append((w, b))
    return params


if __name__ == "__main__":
    key = jax.random.PRNGKey(0)
    key, xk = jax.random.split(key)

    B, C, T = 2, 4, 16                # small shapes consistent with Conv1d(channels, channels)
    kernel_size = 3
    dilation = (1, 3)

    x = jax.random.normal(xk, (B, C, T), dtype=jnp.float32)
    params = init_params(key, C, kernel_size)

    out = res_block2_forward(x, params, kernel_size, dilation)
    out = jax.block_until_ready(out)

    ref = res_block2_reference(x, params, kernel_size, dilation)
    assert out.shape == (B, C, T)
    # bf16 MXU inputs vs. f32 reference -> slightly loosened tolerance.
    assert jnp.allclose(out, ref, atol=5e-3, rtol=5e-3), "mismatch vs reference"

    print("KERNEL_OK")
</pallas_src>

<mosaic_0001>
module attributes {stable_mosaic.version = 11 : i64} {
  func.func @_resblock2_kernel(%arg0: i32, %arg1: i32, %arg2: memref<1x4x16xf32, #tpu.memory_space<vmem>>, %arg3: memref<1x1x4x8xf32, #tpu.memory_space<vmem>>, %arg4: memref<3x4x4xbf16, #tpu.memory_space<vmem>>, %arg5: memref<4x1xf32, #tpu.memory_space<vmem>>, %arg6: memref<3x4x4xbf16, #tpu.memory_space<vmem>>, %arg7: memref<4x1xf32, #tpu.memory_space<vmem>>, %arg8: memref<1x4x16xf32, #tpu.memory_space<vmem>>, %arg9: memref<4x148xf32, #tpu.memory_space<vmem>>, %arg10: memref<4x22xf32, #tpu.memory_space<vmem>>) attributes {dimension_semantics = [#tpu.dimension_semantics<parallel>, #tpu.dimension_semantics<parallel>], iteration_bounds = array<i64: 2, 1>, scalar_prefetch = 0 : i64, scratch_operands = 2 : i64, tpu.core_type = #tpu.core_type<tc>, window_params = [{transform_indices = @transform_0, window_bounds = array<i64: 1, 4, 16>}, {transform_indices = @transform_1, window_bounds = array<i64: 1, 1, 4, 8>}, {pipeline_mode = #tpu.pipeline_mode<synchronous>, transform_indices = @transform_2, window_bounds = array<i64: 3, 4, 4>}, {pipeline_mode = #tpu.pipeline_mode<synchronous>, transform_indices = @transform_3, window_bounds = array<i64: 4, 1>}, {pipeline_mode = #tpu.pipeline_mode<synchronous>, transform_indices = @transform_4, window_bounds = array<i64: 3, 4, 4>}, {pipeline_mode = #tpu.pipeline_mode<synchronous>, transform_indices = @transform_5, window_bounds = array<i64: 4, 1>}, {transform_indices = @transform_6, window_bounds = array<i64: 1, 4, 16>}]} {
    %c0 = arith.constant 0 : index
    %c0_0 = arith.constant 0 : index
    %c0_1 = arith.constant 0 : index
    %c0_2 = arith.constant 0 : index
    %0 = vector.load %arg3[%c0, %c0_0, %c0_1, %c0_2] : memref<1x1x4x8xf32, #tpu.memory_space<vmem>>, vector<1x1x4x8xf32>
    %1 = vector.shape_cast %0 : vector<1x1x4x8xf32> to vector<4x8xf32>
    %2 = vector.extract_strided_slice %1 {offsets = [0, 0], sizes = [4, 4], strides = [1, 1]} : vector<4x8xf32> to vector<4x4xf32>
    %c0_3 = arith.constant 0 : index
    %c124 = arith.constant 124 : index
    %3 = vector.load %arg9[%c0_3, %c124] : memref<4x148xf32, #tpu.memory_space<vmem>>, vector<4x4xf32>
    tpu.vector_store %arg9[%c0_3, %c124], %2 {strides = array<i32>} : memref<4x148xf32, #tpu.memory_space<vmem>>, vector<4x4xf32>,
    %4 = vector.extract_strided_slice %1 {offsets = [0, 4], sizes = [4, 4], strides = [1, 1]} : vector<4x8xf32> to vector<4x4xf32>
    %c0_4 = arith.constant 0 : index
    %c144 = arith.constant 144 : index
    %5 = vector.load %arg9[%c0_4, %c144] : memref<4x148xf32, #tpu.memory_space<vmem>>, vector<4x4xf32>
    tpu.vector_store %arg9[%c0_4, %c144], %4 {strides = array<i32>} : memref<4x148xf32, #tpu.memory_space<vmem>>, vector<4x4xf32>,
    %c0_5 = arith.constant 0 : index
    %c0_6 = arith.constant 0 : index
    %c0_7 = arith.constant 0 : index
    %6 = vector.load %arg2[%c0_5, %c0_6, %c0_7] : memref<1x4x16xf32, #tpu.memory_space<vmem>>, vector<1x4x16xf32>
    %7 = vector.shape_cast %6 : vector<1x4x16xf32> to vector<4x16xf32>
    %c0_8 = arith.constant 0 : index
    %c128 = arith.constant 128 : index
    %8 = vector.load %arg9[%c0_8, %c128] : memref<4x148xf32, #tpu.memory_space<vmem>>, vector<4x16xf32>
    tpu.vector_store %arg9[%c0_8, %c128], %7 {strides = array<i32>} : memref<4x148xf32, #tpu.memory_space<vmem>>, vector<4x16xf32>,
    %c0_9 = arith.constant 0 : index
    %c0_10 = arith.constant 0 : index
    %9 = vector.load %arg5[%c0_9, %c0_10] : memref<4x1xf32, #tpu.memory_space<vmem>>, vector<4x1xf32>
    %10 = vector.shape_cast %9 : vector<4x1xf32> to vector<4x1xf32>
    %11 = vector.broadcast %10 : vector<4x1xf32> to vector<4x22xf32>
    %c0_11 = arith.constant 0 : index
    %c124_12 = arith.constant 124 : index
    %12 = vector.load %arg9[%c0_11, %c124_12] : memref<4x148xf32, #tpu.memory_space<vmem>>, vector<4x22xf32>
    %cst = arith.constant 0.000000e+00 : f32
    %13 = vector.broadcast %cst : f32 to vector<4x22xf32>
    %14 = arith.cmpf oge, %12, %13 : vector<4x22xf32>
    %cst_13 = arith.constant 1.000000e-01 : f32
    %15 = vector.broadcast %cst_13 : f32 to vector<4x22xf32>
    %16 = arith.mulf %15, %12 : vector<4x22xf32>
    %17 = arith.select %14, %12, %16 : vector<4x22xi1>, vector<4x22xf32>
    %c0_14 = arith.constant 0 : index
    %c0_15 = arith.constant 0 : index
    %c0_16 = arith.constant 0 : index
    %18 = vector.load %arg4[%c0_14, %c0_15, %c0_16] : memref<3x4x4xbf16, #tpu.memory_space<vmem>>, vector<1x4x4xbf16>
    %19 = vector.shape_cast %18 : vector<1x4x4xbf16> to vector<4x4xbf16>
    %20 = arith.truncf %17 : vector<4x22xf32> to vector<4x22xbf16>
    %cst_17 = arith.constant dense<0.000000e+00> : vector<4x22xf32>
    %21 = tpu.matmul %19, %20, %cst_17 {dimension_numbers = #tpu.dot_dimension_numbers<[1], [0], [0], [1], [0, 0, 1, 1], [], []>} : vector<4x4xbf16>, vector<4x22xbf16>, vector<4x22xf32> -> vector<4x22xf32>
    %22 = arith.addf %11, %21 : vector<4x22xf32>
    %c0_18 = arith.constant 0 : index
    %c125 = arith.constant 125 : index
    %23 = vector.load %arg9[%c0_18, %c125] : memref<4x148xf32, #tpu.memory_space<vmem>>, vector<4x22xf32>
    %cst_19 = arith.constant 0.000000e+00 : f32
    %24 = vector.broadcast %cst_19 : f32 to vector<4x22xf32>
    %25 = arith.cmpf oge, %23, %24 : vector<4x22xf32>
    %cst_20 = arith.constant 1.000000e-01 : f32
    %26 = vector.broadcast %cst_20 : f32 to vector<4x22xf32>
    %27 = arith.mulf %26, %23 : vector<4x22xf32>
    %28 = arith.select %25, %23, %27 : vector<4x22xi1>, vector<4x22xf32>
    %c1 = arith.constant 1 : index
    %c0_21 = arith.constant 0 : index
    %c0_22 = arith.constant 0 : index
    %29 = vector.load %arg4[%c1, %c0_21, %c0_22] : memref<3x4x4xbf16, #tpu.memory_space<vmem>>, vector<1x4x4xbf16>
    %30 = vector.shape_cast %29 : vector<1x4x4xbf16> to vector<4x4xbf16>
    %31 = arith.truncf %28 : vector<4x22xf32> to vector<4x22xbf16>
    %cst_23 = arith.constant dense<0.000000e+00> : vector<4x22xf32>
    %32 = tpu.matmul %30, %31, %cst_23 {dimension_numbers = #tpu.dot_dimension_numbers<[1], [0], [0], [1], [0, 0, 1, 1], [], []>} : vector<4x4xbf16>, vector<4x22xbf16>, vector<4x22xf32> -> vector<4x22xf32>
    %33 = arith.addf %22, %32 : vector<4x22xf32>
    %c0_24 = arith.constant 0 : index
    %c126 = arith.constant 126 : index
    %34 = vector.load %arg9[%c0_24, %c126] : memref<4x148xf32, #tpu.memory_space<vmem>>, vector<4x22xf32>
    %cst_25 = arith.constant 0.000000e+00 : f32
    %35 = vector.broadcast %cst_25 : f32 to vector<4x22xf32>
    %36 = arith.cmpf oge, %34, %35 : vector<4x22xf32>
    %cst_26 = arith.constant 1.000000e-01 : f32
    %37 = vector.broadcast %cst_26 : f32 to vector<4x22xf32>
    %38 = arith.mulf %37, %34 : vector<4x22xf32>
    %39 = arith.select %36, %34, %38 : vector<4x22xi1>, vector<4x22xf32>
    %c2 = arith.constant 2 : index
    %c0_27 = arith.constant 0 : index
    %c0_28 = arith.constant 0 : index
    %40 = vector.load %arg4[%c2, %c0_27, %c0_28] : memref<3x4x4xbf16, #tpu.memory_space<vmem>>, vector<1x4x4xbf16>
    %41 = vector.shape_cast %40 : vector<1x4x4xbf16> to vector<4x4xbf16>
    %42 = arith.truncf %39 : vector<4x22xf32> to vector<4x22xbf16>
    %cst_29 = arith.constant dense<0.000000e+00> : vector<4x22xf32>
    %43 = tpu.matmul %41, %42, %cst_29 {dimension_numbers = #tpu.dot_dimension_numbers<[1], [0], [0], [1], [0, 0, 1, 1], [], []>} : vector<4x4xbf16>, vector<4x22xbf16>, vector<4x22xf32> -> vector<4x22xf32>
    %44 = arith.addf %33, %43 : vector<4x22xf32>
    %c0_30 = arith.constant 0 : index
    %c125_31 = arith.constant 125 : index
    %45 = vector.load %arg9[%c0_30, %c125_31] : memref<4x148xf32, #tpu.memory_space<vmem>>, vector<4x22xf32>
    %46 = arith.addf %44, %45 : vector<4x22xf32>
    %47 = tpu.iota {dimensions = array<i32: 1>} : vector<4x22xi32>
    %c16_i32 = arith.constant 16 : i32
    %48 = arith.muli %arg1, %c16_i32 : i32
    %c3_i32 = arith.constant 3 : i32
    %49 = arith.subi %48, %c3_i32 : i32
    %50 = vector.broadcast %49 : i32 to vector<4x22xi32>
    %51 = arith.addi %47, %50 : vector<4x22xi32>
    %c0_i32 = arith.constant 0 : i32
    %52 = vector.broadcast %c0_i32 : i32 to vector<4x22xi32>
    %53 = arith.cmpi sge, %51, %52 : vector<4x22xi32>
    %c16_i32_32 = arith.constant 16 : i32
    %54 = vector.broadcast %c16_i32_32 : i32 to vector<4x22xi32>
    %55 = arith.cmpi slt, %51, %54 : vector<4x22xi32>
    %56 = arith.andi %53, %55 : vector<4x22xi1>
    %cst_33 = arith.constant 0.000000e+00 : f32
    %57 = vector.broadcast %cst_33 : f32 to vector<4x22xf32>
    %58 = arith.select %56, %46, %57 : vector<4x22xi1>, vector<4x22xf32>
    %c0_34 = arith.constant 0 : index
    %c0_35 = arith.constant 0 : index
    %59 = vector.load %arg10[%c0_34, %c0_35] : memref<4x22xf32, #tpu.memory_space<vmem>>, vector<4x22xf32>
    tpu.vector_store %arg10[%c0_34, %c0_35], %58 {strides = array<i32>} : memref<4x22xf32, #tpu.memory_space<vmem>>, vector<4x22xf32>,
    %c0_36 = arith.constant 0 : index
    %c0_37 = arith.constant 0 : index
    %60 = vector.load %arg7[%c0_36, %c0_37] : memref<4x1xf32, #tpu.memory_space<vmem>>, vector<4x1xf32>
    %61 = vector.shape_cast %60 : vector<4x1xf32> to vector<4x1xf32>
    %62 = vector.broadcast %61 : vector<4x1xf32> to vector<4x16xf32>
    %c0_38 = arith.constant 0 : index
    %c0_39 = arith.constant 0 : index
    %63 = vector.load %arg10[%c0_38, %c0_39] : memref<4x22xf32, #tpu.memory_space<vmem>>, vector<4x16xf32>
    %cst_40 = arith.constant 0.000000e+00 : f32
    %64 = vector.broadcast %cst_40 : f32 to vector<4x16xf32>
    %65 = arith.cmpf oge, %63, %64 : vector<4x16xf32>
    %cst_41 = arith.constant 1.000000e-01 : f32
    %66 = vector.broadcast %cst_41 : f32 to vector<4x16xf32>
    %67 = arith.mulf %66, %63 : vector<4x16xf32>
    %68 = arith.select %65, %63, %67 : vector<4x16xi1>, vector<4x16xf32>
    %c0_42 = arith.constant 0 : index
    %c0_43 = arith.constant 0 : index
    %c0_44 = arith.constant 0 : index
    %69 = vector.load %arg6[%c0_42, %c0_43, %c0_44] : memref<3x4x4xbf16, #tpu.memory_space<vmem>>, vector<1x4x4xbf16>
    %70 = vector.shape_cast %69 : vector<1x4x4xbf16> to vector<4x4xbf16>
    %71 = arith.truncf %68 : vector<4x16xf32> to vector<4x16xbf16>
    %cst_45 = arith.constant dense<0.000000e+00> : vector<4x16xf32>
    %72 = tpu.matmul %70, %71, %cst_45 {dimension_numbers = #tpu.dot_dimension_numbers<[1], [0], [0], [1], [0, 0, 1, 1], [], []>} : vector<4x4xbf16>, vector<4x16xbf16>, vector<4x16xf32> -> vector<4x16xf32>
    %73 = arith.addf %62, %72 : vector<4x16xf32>
    %c0_46 = arith.constant 0 : index
    %c3 = arith.constant 3 : index
    %74 = vector.load %arg10[%c0_46, %c3] : memref<4x22xf32, #tpu.memory_space<vmem>>, vector<4x16xf32>
    %cst_47 = arith.constant 0.000000e+00 : f32
    %75 = vector.broadcast %cst_47 : f32 to vector<4x16xf32>
    %76 = arith.cmpf oge, %74, %75 : vector<4x16xf32>
    %cst_48 = arith.constant 1.000000e-01 : f32
    %77 = vector.broadcast %cst_48 : f32 to vector<4x16xf32>
    %78 = arith.mulf %77, %74 : vector<4x16xf32>
    %79 = arith.select %76, %74, %78 : vector<4x16xi1>, vector<4x16xf32>
    %c1_49 = arith.constant 1 : index
    %c0_50 = arith.constant 0 : index
    %c0_51 = arith.constant 0 : index
    %80 = vector.load %arg6[%c1_49, %c0_50, %c0_51] : memref<3x4x4xbf16, #tpu.memory_space<vmem>>, vector<1x4x4xbf16>
    %81 = vector.shape_cast %80 : vector<1x4x4xbf16> to vector<4x4xbf16>
    %82 = arith.truncf %79 : vector<4x16xf32> to vector<4x16xbf16>
    %cst_52 = arith.constant dense<0.000000e+00> : vector<4x16xf32>
    %83 = tpu.matmul %81, %82, %cst_52 {dimension_numbers = #tpu.dot_dimension_numbers<[1], [0], [0], [1], [0, 0, 1, 1], [], []>} : vector<4x4xbf16>, vector<4x16xbf16>, vector<4x16xf32> -> vector<4x16xf32>
    %84 = arith.addf %73, %83 : vector<4x16xf32>
    %c0_53 = arith.constant 0 : index
    %c6 = arith.constant 6 : index
    %85 = vector.load %arg10[%c0_53, %c6] : memref<4x22xf32, #tpu.memory_space<vmem>>, vector<4x16xf32>
    %cst_54 = arith.constant 0.000000e+00 : f32
    %86 = vector.broadcast %cst_54 : f32 to vector<4x16xf32>
    %87 = arith.cmpf oge, %85, %86 : vector<4x16xf32>
    %cst_55 = arith.constant 1.000000e-01 : f32
    %88 = vector.broadcast %cst_55 : f32 to vector<4x16xf32>
    %89 = arith.mulf %88, %85 : vector<4x16xf32>
    %90 = arith.select %87, %85, %89 : vector<4x16xi1>, vector<4x16xf32>
    %c2_56 = arith.constant 2 : index
    %c0_57 = arith.constant 0 : index
    %c0_58 = arith.constant 0 : index
    %91 = vector.load %arg6[%c2_56, %c0_57, %c0_58] : memref<3x4x4xbf16, #tpu.memory_space<vmem>>, vector<1x4x4xbf16>
    %92 = vector.shape_cast %91 : vector<1x4x4xbf16> to vector<4x4xbf16>
    %93 = arith.truncf %90 : vector<4x16xf32> to vector<4x16xbf16>
    %cst_59 = arith.constant dense<0.000000e+00> : vector<4x16xf32>
    %94 = tpu.matmul %92, %93, %cst_59 {dimension_numbers = #tpu.dot_dimension_numbers<[1], [0], [0], [1], [0, 0, 1, 1], [], []>} : vector<4x4xbf16>, vector<4x16xbf16>, vector<4x16xf32> -> vector<4x16xf32>
    %95 = arith.addf %84, %94 : vector<4x16xf32>
    %c0_60 = arith.constant 0 : index
    %c3_61 = arith.constant 3 : index
    %96 = vector.load %arg10[%c0_60, %c3_61] : memref<4x22xf32, #tpu.memory_space<vmem>>, vector<4x16xf32>
    %97 = arith.addf %95, %96 : vector<4x16xf32>
    %c0_62 = arith.constant 0 : index
    %c0_63 = arith.constant 0 : index
    %c0_64 = arith.constant 0 : index
    %98 = vector.load %arg8[%c0_62, %c0_63, %c0_64] : memref<1x4x16xf32, #tpu.memory_space<vmem>>, vector<1x4x16xf32>
    %99 = vector.shape_cast %98 : vector<1x4x16xf32> to vector<4x16xf32>
    %100 = vector.shape_cast %97 : vector<4x16xf32> to vector<1x4x16xf32>
    tpu.vector_store %arg8[%c0_62, %c0_63, %c0_64], %100 {strides = array<i32>} : memref<1x4x16xf32, #tpu.memory_space<vmem>>, vector<1x4x16xf32>,
    return
  }
  func.func @transform_0(%arg0: i32, %arg1: i32) -> (i32, i32, i32) {
    %c0_i32 = arith.constant 0 : i32
    %c0_i32_0 = arith.constant 0 : i32
    return %arg0, %c0_i32, %arg1 : i32, i32, i32
  }
  func.func @transform_1(%arg0: i32, %arg1: i32) -> (i32, i32, i32, i32) {
    %c0_i32 = arith.constant 0 : i32
    %c0_i32_0 = arith.constant 0 : i32
    %c0_i32_1 = arith.constant 0 : i32
    return %arg0, %arg1, %c0_i32, %c0_i32_0 : i32, i32, i32, i32
  }
  func.func @transform_2(%arg0: i32, %arg1: i32) -> (i32, i32, i32) {
    %c0_i32 = arith.constant 0 : i32
    %c0_i32_0 = arith.constant 0 : i32
    %c0_i32_1 = arith.constant 0 : i32
    %c0_i32_2 = arith.constant 0 : i32
    return %c0_i32, %c0_i32_0, %c0_i32_1 : i32, i32, i32
  }
  func.func @transform_3(%arg0: i32, %arg1: i32) -> (i32, i32) {
    %c0_i32 = arith.constant 0 : i32
    %c0_i32_0 = arith.constant 0 : i32
    %c0_i32_1 = arith.constant 0 : i32
    return %c0_i32, %c0_i32_0 : i32, i32
  }
  func.func @transform_4(%arg0: i32, %arg1: i32) -> (i32, i32, i32) {
    %c0_i32 = arith.constant 0 : i32
    %c0_i32_0 = arith.constant 0 : i32
    %c0_i32_1 = arith.constant 0 : i32
    %c0_i32_2 = arith.constant 0 : i32
    return %c0_i32, %c0_i32_0, %c0_i32_1 : i32, i32, i32
  }
  func.func @transform_5(%arg0: i32, %arg1: i32) -> (i32, i32) {
    %c0_i32 = arith.constant 0 : i32
    %c0_i32_0 = arith.constant 0 : i32
    %c0_i32_1 = arith.constant 0 : i32
    return %c0_i32, %c0_i32_0 : i32, i32
  }
  func.func @transform_6(%arg0: i32, %arg1: i32) -> (i32, i32, i32) {
    %c0_i32 = arith.constant 0 : i32
    %c0_i32_0 = arith.constant 0 : i32
    return %arg0, %c0_i32, %arg1 : i32, i32, i32
  }
}

</mosaic_0001>

<bundles_post_ra>
// kernel: tpu_custom_call.1
= control target key start
LH: loop header
LB: loop body
LE: loop exit
PB: predicated region body
PF: predicated region fallthrough
CT: control target
= control target key end

     0   :  { %11 = vsyncpa [#allocation5], 0  ;;  %s1380_s0 = inlined_call_operand.vmem [shape: f32[2,4,16], index: 0, kind: input, shape index: {}]   ;;  %s1381_s1 = inlined_call_operand.hbm [shape: f32[2,1,4,8], index: 1, kind: input, shape index: {}]   ;;  %s1382_s2 = inlined_call_operand.vmem [shape: bf16[3,4,4], index: 2, kind: input, shape index: {}]   ;;  %s1383_s3 = inlined_call_operand.vmem [shape: f32[4,1], index: 3, kind: input, shape index: {}]   ;;  %s1384_s4 = inlined_call_operand.vmem [shape: bf16[3,4,4], index: 4, kind: input, shape index: {}]   ;;  %s1385_s5 = inlined_call_operand.vmem [shape: f32[4,1], index: 5, kind: input, shape index: {}]   ;;  %s1386_s6 = inlined_call_operand.hbm [shape: f32[2,4,16], index: 6, kind: output, shape index: {}]  }
   0x1   :  { %13 = vsyncpa [#allocation5 + $0x1], 0 }
   0x2   :  { %14 = vsyncpa [#allocation6], 0 }
   0x3   :  { %16 = vsyncpa [#allocation6 + $0x1], 0  ;;  %s1140_s21 = smov 0   ;;  %s1142_s22 = smov 0  }
   0x4   :  { %s1144_s23 = smov 0   ;;  %s1146_s24 = smov 0  }
   0x5   :  { %s1148_s25 = smov 0   ;;  %s1150_s26 = smov 0  }
   0x6 LB: > { %s833_s27 = sadd.s32 4294967295, %s1091_s26   ;;  %s834_s28 = sadd.s32 4294967294, %s1091_s26   ;;  %s1091_s26 = sphi %s1150_s26, %s22_s26   ;;  %s1087_s25 = sphi %s1148_s25, %s1402_s25   ;;  %s1083_s24 = sphi %s1146_s24, %s1401_s24   ;;  %s1079_s23 = sphi %s1144_s23, %s1400_s23   ;;  %s1075_s22 = sphi %s1142_s22, %s1399_s22   ;;  %s1071_s21 = sphi %s1140_s21, %s1398_s21  }
   0x7   : > { %s34_s29 = sadd.s32 1, %s1087_s25  ;;  %s71_s30 = sadd.s32 1, %s1079_s23 }
   0x8   : > { %p36_p0 = scmp.ge.s32.totalorder %s34_s29, 2  ;;  %p78_p1 = scmp.ne.s32.totalorder %s1079_s23, %s1075_s22 }
   0x9   : > { %p79_p2 = scmp.eq.s32.totalorder %s1091_s26, 0  ;;  %p84_p3 = scmp.ne.s32.totalorder %s1075_s22, %s1071_s21 }
   0xa   : > { %s1404_s29 = smov (%p36_p0, %s34_s29), 0  ;;  %p85_p5 = scmp.eq.s32.totalorder %s833_s27, 0 }
   0xb   : > { %p1181_p4 = por %p79_p2, %p78_p1  ;;  %s66_s8 = ssub.s32 %s1087_s25, %s1404_s29 }
   0xc   : > { %p194_p6 = scmp.eq.s32.totalorder %s833_s27, 1  ;;  %p69_p7 = scmp.eq.s32.totalorder %s66_s8, 0 }
   0xd   : > { %p1187_p8 = por %p85_p5, %p84_p3  ;;  %p200_p10 = scmp.eq.s32.totalorder %s834_s28, 1 }
   0xe   : > { %p1191_p9 = por %p194_p6, %p78_p1  ;;  %p917_p13 = scmp.lt.s32.totalorder %s1091_s26, 2 }
   0xf   : > { %s1196_s11 = scalar_select %p69_p7, %s1079_s23, %s71_s30  }
  0x10   : > { %s1390_s10 = scalar_select %p1191_p9, 1, 0 }
  0x11   : > { %p1198_p11 = por %p200_p10, %p84_p3  ;;  %s242_s13 = sand.u32 1, %s1079_s23  }
  0x12   : > { %s837_s14 = sshll.u32 %s242_s13, 2  ;;  %s838_s15 = sshll.u32 %s1087_s25, 6 }
  0x13   : > { %s1391_s12 = scalar_select %p1198_p11, 1, 0 }
  0x14   : > { %s1209_s18 = scalar_lea.hbm %s1381_s1, %s838_s15  ;;  %s246_s19 = scalar_lea.vmem [#allocation4], %s837_s14 }
  0x15   : > { %s254_s20 = sshll.u32 %s246_s19, 4  ;;  %p1215_p0 = pnand %p917_p13, %p1181_p4  ;;  %s1211_s20 = int_to_ptr.vmem [resolvable:$true] %s254_s20 }
  0x16   : > { %s243_s28 = scalar_lea.sflag [#allocation5], %s242_s13  ;;  %s979_s30 = scalar_lea.hbm %s1209_s18, 64 }
  0x17   : > { %p980_p3 = scmp.ne.s32.totalorder %s1209_s18, %s979_s30  ;;  %p981_p5 = pneg %p1215_p0 }
  0x18   : > { %s984_s7 = scalar_lea.hbm %s1381_s1, 128  ;;  %p985_p4 = scmp.lt.u32.totalorder %s1209_s18, %s1381_s1 }
  0x19   : > { %p982_p6 = pnand %p981_p5, %p980_p3  ;;  %p986_p10 = scmp.lt.u32.totalorder %s984_s7, %s979_s30 }
  0x1a   : > { %p988_p12 = scmp.lt.u32.totalorder %s979_s30, %s1209_s18 }
  0x1b   : > { %p983_p7 = pneg %p982_p6  ;;  %p987_p13 = por %p986_p10, %p985_p4 }
  0x1d   : > { %p989_p1 = por %p988_p12, %p987_p13 }
  0x1f   : > { %p990_p2 = pnand %p989_p1, %p983_p7 }
  0x21   : > { %993 = shalt.err (!%p990_p2)
}
  0x22   : > { %s994_s13 = scalar_lea.vmem %s1211_s20, 64  ;;  %s1093_s17 = smov [#allocation4]  }
  0x23   : > { %p995_p3 = scmp.ne.s32.totalorder %s1211_s20, %s994_s13  ;;  %s999_s19 = sshll.u32 %s1093_s17, 4  ;;  %s1000_s19 = int_to_ptr.vmem [resolvable:$false] %s999_s19 }
  0x24   : > { %s1001_s8 = scalar_lea.vmem %s1000_s19, 128  ;;  %p1002_p9 = scmp.lt.s32.totalorder %s1211_s20, %s1000_s19 }
  0x25   : > { %p997_p6 = pnand %p995_p3, %p981_p5  ;;  %p1003_p4 = scmp.lt.s32.totalorder %s1001_s8, %s994_s13 }
  0x27   : > { %p998_p11 = pneg %p997_p6  ;;  %p1004_p10 = por %p1003_p4, %p1002_p9 }
  0x29   : > { %p1005_p12 = pnand %p1004_p10, %p998_p11 }
  0x2b   : > { %1008 = shalt.err (!%p1005_p12)
}
  0x2c   : > { %912 = dma.hbm_to_vmem [thread:$0]  (!%p1215_p0), %s1209_s18, 64, %s1211_s20, %s243_s28  }
  0x2d   : > { %p1393_p1 = scmp.lt.s32.totalorder %s1091_s26, 3  ;;  %p1394_p2 = scmp.ge.s32.totalorder %s1091_s26, 1 }
  0x2f   : > { %p260_p5 = pnand %p1394_p2, %p1393_p1 }
  0x30   : > { %s1251_s30 = sand.u32 (!%p260_p5), 1, %s1075_s22  }
  0x31   : > { %263 = sbr.rel (%p260_p5) target bundleno = 903 (0x387), region = 44  ;;  %s840_s14 = sshll.u32 (!%p260_p5), %s1251_s30, 2 }
  0x32   : > { %s266_s7 = scalar_lea.sflag (!%p260_p5), [#allocation5], %s1251_s30  ;;  %s269_s27 = scalar_lea.vmem (!%p260_p5), [#allocation4], %s840_s14 }
  0x38   : > { %1062 = dma.done.wait (%p1187_p8), %s266_s7, 64  }
  0x39   : > { %1064 = vsyncadd (%p1187_p8), %s266_s7, 4294967232  ;;  %v313_v0 = vld [vmem:[%s269_s27] sm:$0xf]  ;;  %s1094_s18 = smov 12   ;;  %s1095_s20 = smov 124   ;;  %vm323_vm0 = vcmask 158848   ;;  %v543_v29 = vlaneseq }
  0x3a   : > { %320 = vrot.lane.b32.xlu0 %v313_v0, %s1094_s18  ;;  %p305_p9 = scmp.lt.s32.totalorder %s1083_s24, 1  ;;  %vm326_vm1 = vcmask 125952   ;;  %vm318_vm2 = vcmask 1044448   ;;  %v1096_v4 = vmov 0.0   ;;  %vm1097_vm4 = vmmov 0   ;;  %s1098_s9 = smov 3  }
  0x3b   : > { %869 = vmatprep.subr.bf16.mxu0 %v1096_v4  ;;  %875 = vmatprep.subr.bf16.mxu1 %v1096_v4  ;;  %s1099_s19 = smov 4   ;;  %s1100_s8 = smov 2   ;;  %v328_v11 = vld [vmem:[%s1383_s3] sm:$0xf]  ;;  %v1101_v12 = vmov 0   ;;  %vm350_vm5 = vcmask 31744  }
  0x3c   : > { %s306_s28 = scalar_select %p305_p9, %s1083_s24, 1  ;;  %871 = vmatprep.mubr.msk.bf16.mxu0 %vm1097_vm4, %v1096_v4  ;;  %877 = vmatprep.mubr.msk.bf16.mxu1 %vm1097_vm4, %v1096_v4  ;;  %vm356_vm6 = vcmask 1041408   ;;  %vm418_vm7 = vcmask 23552   ;;  %v338_v19 = vld [vmem:[%s1382_s2] sm:$0x3]  ;;  %vm484_vm8 = vcmask 15360  }
  0x3d   : > { %977 = vset.pattern.permute.xlu0 %v1101_v12  ;;  %v844_v23 = vld [vmem:[%s1382_s2 + $0x2] sm:$0x3]  ;;  %v846_v28 = vld [vmem:[%s1382_s2 + $0x4] sm:$0x3]  ;;  %v544_v30 = vand.u32 127, %v543_v29  ;;  %vm553_vm12 = vcmask 175104  }
  0x3e   : > { %315 = vrot.lane.b32.xlu0 %v313_v0, %s1095_s20  ;;  %s842_s15 = sshll.u32 %s306_s28, 2  ;;  %v555_v58 = vld [vmem:[%s1385_s5] sm:$0xf]  ;;  %s854_s16 = sshll.u32 %s1083_s24, 6 }
  0x3f   : > { %s311_s17 = scalar_lea.vmem %s1380_s0, %s842_s15  ;;  %v548_v38 = vadd.s32 4294967293, %v544_v30  ;;  %v565_v59 = vld [vmem:[%s1384_s4] sm:$0x3]  ;;  %v849_v0 = vld [vmem:[%s1384_s4 + $0x2] sm:$0x3]  ;;  %s304_s13 = scalar_lea.vmem [#allocation7], %s840_s14 }
  0x40   : > { %v325_v1 = vld [vmem:[%s311_s17] sm:$0xf]  ;;  %s1102_s17 = smov 122   ;;  %s724_s24 = scalar_lea.sflag [#allocation6], %s1251_s30 }
  0x41   : > { %vm549_vm9 = vcmp.ge.s32.totalorder %v548_v38, 0  ;;  %vm550_vm10 = vcmp.lt.s32.totalorder %v548_v38, 16  ;;  %p1395_p11 = scmp.ne.s32.totalorder %s1390_s10, 0  ;;  %s1104_s7 = smov [#allocation7]  }
  0x42   : > { %vm551_vm11 = vmand %vm549_vm9, %vm550_vm10  ;;  %s1013_s27 = sshll.u32 %s1104_s7, 4  ;;  %s1014_s27 = int_to_ptr.vmem [resolvable:$false] %s1013_s27 }
  0x43   : > { %s1015_s18 = scalar_lea.vmem %s1014_s27, 128 }
  0xac   : > { %v321_v2 = vpop.permute.xlu0 %320 }
  0xad   : > { %324 = vst.msk [vmem:[#allocation2 + $0x4] sm:$0xf] %vm323_vm0, %v321_v2 }
  0xae   : > { %327 = vst.msk [vmem:[#allocation2 + $0x4] sm:$0xf] %vm326_vm1, %v325_v1  ;;  %v851_v1 = vld [vmem:[%s1384_s4 + $0x4] sm:$0x3] }
  0xb0   : > { %v316_v3 = vpop.permute.xlu0 %315 }
  0xb1   : > { %319 = vst.msk [vmem:[#allocation2] sm:$0xf] %vm318_vm2, %v316_v3 }
  0xb8   : > { %v401_v5 = vld [vmem:[#allocation2] sm:$0xff] }
  0xb9   : > { %vm402_vm3 = vcmp.ge.f32.partialorder %v401_v5, 0.0  ;;  %v403_v6 = vmul.f32 0.1, %v401_v5  ;;  %v534_v13 = vcombine.high %v401_v5, %v401_v5 }
  0xbb   : > { %v404_v7 = vsel %vm402_vm3, %v401_v5, %v403_v6 }
  0xbc   : > { %v410_v8 = vpack.c.bf16 %v404_v7, %v404_v7  ;;  %v340_v9 = vcombine.high %v404_v7, %v404_v7 }
  0xbe   : > { %414 = vrot.lane.b32.xlu0 %v410_v8, %s1098_s9  ;;  %346 = vrot.lane.b32.xlu1 %v410_v8, %s1099_s19  ;;  %v343_v10 = vpack.c.bf16 %v340_v9, %v340_v9 }
  0xc2   : > { %480 = vrot.lane.b32.xlu0 %v410_v8, %s1100_s8  ;;  %348 = vrot.lane.b32.xlu1 %v343_v10, %s1099_s19 }
  0xc6   : > { %416 = vrot.lane.b32.xlu1 %v343_v10, %s1098_s9  ;;  %331 = vperm.xlu0 %977, %v328_v11  }
  0xca   : > { %482 = vrot.lane.b32.xlu1 %v343_v10, %s1100_s8  ;;  %s1330_s8 = scalar_lea.hbm %s1386_s6, %s854_s16 }
  0xce   : > { %535 = vrot.lane.b32.xlu1 %v401_v5, %s1098_s9 }
  0xd2   : > { %537 = vrot.lane.b32.xlu1 %v534_v13, %s1098_s9  ;;  %s1103_s9 = smov 125  }
 0x130   : > { %v347_v14 = vpop.permute.xlu1 %346  ;;  %v415_v17 = vpop.permute.xlu0 %414 }
 0x134   : > { %v349_v15 = vpop.permute.xlu1 %348  ;;  %v481_v24 = vpop.permute.xlu0 %480 }
 0x135   : > { %v351_v16 = vsel %vm350_vm5, %v347_v14, %v349_v15 }
 0x136   : > { %v358_v18 = vsel %vm356_vm6, %v351_v16, 0 }
 0x137   : > { %870 = vmatpush3.bf16.msra.mxu0 %v358_v18 }
 0x138   : > { %v417_v20 = vpop.permute.xlu1 %416  ;;  %881 = vmatprep.subr.bf16.mxu0 %v1096_v4 }
 0x139   : > { %v419_v21 = vsel %vm418_vm7, %v415_v17, %v417_v20 }
 0x13a   : > { %872 = vmatmul.mubr.msk.bf16.vlgmr.msra.gmra.mrb[0].mxu0 %vm350_vm5, %v338_v19  ;;  %v424_v22 = vsel %vm356_vm6, %v419_v21, 0 }
 0x13b   : > { %876 = vmatpush3.bf16.msra.mxu1 %v424_v22  ;;  %883 = vmatprep.mubr.msk.bf16.mxu0 %vm1097_vm4, %v1096_v4 }
 0x13c   : > { %v483_v25 = vpop.permute.xlu1 %482  ;;  %887 = vmatprep.subr.bf16.mxu1 %v1096_v4 }
 0x13d   : > { %v485_v26 = vsel %vm484_vm8, %v481_v24, %v483_v25 }
 0x13e   : > { %v490_v27 = vsel %vm356_vm6, %v485_v26, 0  ;;  %878 = vmatmul.mubr.msk.bf16.vlgmr.msra.gmra.mrb[0].mxu1 %vm350_vm5, %v844_v23 }
 0x13f   : > { %882 = vmatpush3.bf16.msra.mxu0 %v490_v27  ;;  %889 = vmatprep.mubr.msk.bf16.mxu1 %vm1097_vm4, %v1096_v4 }
 0x140   : > { %893 = vmatprep.subr.bf16.mxu0 %v1096_v4  ;;  %v536_v33 = vpop.permute.xlu1 %535 }
 0x142   : > { %884 = vmatmul.mubr.msk.bf16.vlgmr.msra.gmra.mrb[4].mxu0 %vm350_vm5, %v846_v28 }
 0x143   : > { %895 = vmatprep.mubr.msk.bf16.mxu0 %vm1097_vm4, %v1096_v4 }
 0x144   : > { %v538_v43 = vpop.permute.xlu1 %537 }
 0x145   : > { %v332_v31 = vpop.permute.xlu0 %331  ;;  %v540_v48 = vsel %vm418_vm7, %v536_v33, %v538_v43 }
 0x20d   : > { %v394_v32 = vpop.f32.mrb[0].mxu0 }
 0x20e   : > { %v873_v34 = vpop.f32.mrb[1].mxu0  ;;  %v400_v36 = vadd.f32 %v394_v32, %v332_v31 }
 0x20f   : > { %v397_v35 = vpop.f32.mrb[2].mxu0 }
 0x210   : > { %v874_v37 = vpop.f32.mrb[3].mxu0 }
 0x211   : > { %v460_v39 = vpop.f32.mrb[0].mxu1 }
 0x212   : > { %v466_v40 = vadd.f32 %v460_v39, %v400_v36  ;;  %v879_v41 = vpop.f32.mrb[1].mxu1 }
 0x213   : > { %v463_v42 = vpop.f32.mrb[2].mxu1 }
 0x214   : > { %v880_v44 = vpop.f32.mrb[3].mxu1 }
 0x215   : > { %v526_v45 = vpop.f32.mrb[4].mxu0 }
 0x216   : > { %v532_v46 = vadd.f32 %v526_v45, %v466_v40  ;;  %v885_v47 = vpop.f32.mrb[5].mxu0 }
 0x217   : > { %v529_v49 = vpop.f32.mrb[6].mxu0 }
 0x218   : > { %v542_v50 = vadd.f32 %v540_v48, %v532_v46  ;;  %v886_v51 = vpop.f32.mrb[7].mxu0 }
 0x21a   : > { %v552_v52 = vsel %vm551_vm11, %v542_v50, 0.0 }
 0x21b   : > { %554 = vst.msk [vmem:[#allocation3] sm:$0xf] %vm553_vm12, %v552_v52 }
 0x222   : > { %v561_v53 = vld [vmem:[#allocation3] sm:$0xf] }
 0x223   : > { %vm562_vm13 = vcmp.ge.f32.partialorder %v561_v53, 0.0  ;;  %v563_v54 = vmul.f32 0.1, %v561_v53 }
 0x225   : > { %v564_v55 = vsel %vm562_vm13, %v561_v53, %v563_v54 }
 0x226   : > { %v566_v56 = vpack.c.bf16 %v564_v55, %v564_v55 }
 0x228   : > { %668 = vrot.lane.b32.xlu1 %v566_v56, %s1102_s17  ;;  %617 = vrot.lane.b32.xlu0 %v566_v56, %s1103_s9  ;;  %v571_v57 = vsel %vm356_vm6, %v566_v56, 0  ;;  %s738_s17 = sshll.u32 %s304_s13, 4  ;;  %s1332_s17 = int_to_ptr.vmem [resolvable:$true] %s738_s17 }
 0x229   : > { %888 = vmatpush3.bf16.msra.mxu1 %v571_v57  ;;  %s1009_s14 = scalar_lea.vmem %s1332_s17, 64  ;;  %p1016_p13 = scmp.lt.s32.totalorder %s1332_s17, %s1014_s27 }
 0x22a   : > { %899 = vmatprep.subr.bf16.mxu1 %v1096_v4  ;;  %p1010_p8 = scmp.ne.s32.totalorder %s1332_s17, %s1009_s14  ;;  %p1017_p3 = scmp.lt.s32.totalorder %s1015_s18, %s1009_s14 }
 0x22c   : > { %718 = vrot.lane.b32.xlu1 %v561_v53, %s1103_s9  ;;  %558 = vperm.xlu0 %977, %v555_v58   ;;  %p1011_p0 = pnand %p1010_p8, %p1395_p11  ;;  %p1018_p6 = por %p1017_p3, %p1016_p13 }
 0x22d   : > { %890 = vmatmul.mubr.msk.bf16.vlgmr.msra.gmra.mrb[4].mxu1 %vm350_vm5, %v565_v59 }
 0x22e   : > { %901 = vmatprep.mubr.msk.bf16.mxu1 %vm1097_vm4, %v1096_v4  ;;  %p1012_p7 = pneg %p1011_p0 }
 0x230   : > { %p1019_p4 = pnand %p1018_p6, %p1012_p7 }
 0x29a   : > { %v669_v60 = vpop.permute.xlu1 %668  ;;  %v618_v61 = vpop.permute.xlu0 %617 }
 0x29b   : > { %v674_v62 = vsel %vm356_vm6, %v669_v60, 0  ;;  %v623_v63 = vsel %vm356_vm6, %v618_v61, 0 }
 0x29c   : > { %894 = vmatpush3.bf16.msra.mxu0 %v623_v63  ;;  %900 = vmatpush3.bf16.msra.mxu1 %v674_v62 }
 0x29e   : > { %v719_v18 = vpop.permute.xlu1 %718 }
 0x29f   : > { %896 = vmatmul.mubr.msk.bf16.vlgmr.msra.gmra.mrb[8].mxu0 %vm350_vm5, %v849_v0  ;;  %902 = vmatmul.mubr.msk.bf16.vlgmr.msra.gmra.mrb[8].mxu1 %vm350_vm5, %v851_v1 }
 0x2ab   : > { %v559_v6 = vpop.permute.xlu0 %558 }
 0x300   : > { %v607_v2 = vpop.f32.mrb[4].mxu1 }
 0x301   : > { %v891_v3 = vpop.f32.mrb[5].mxu1  ;;  %v613_v7 = vadd.f32 %v607_v2, %v559_v6 }
 0x302   : > { %v610_v4 = vpop.f32.mrb[6].mxu1 }
 0x303   : > { %v892_v5 = vpop.f32.mrb[7].mxu1 }
 0x372   : > { %v659_v8 = vpop.f32.mrb[8].mxu0  ;;  %v710_v9 = vpop.f32.mrb[8].mxu1 }
 0x373   : > { %v665_v10 = vadd.f32 %v659_v8, %v613_v7  ;;  %v897_v11 = vpop.f32.mrb[9].mxu0  ;;  %v903_v12 = vpop.f32.mrb[9].mxu1 }
 0x374   : > { %v662_v13 = vpop.f32.mrb[10].mxu0  ;;  %v713_v14 = vpop.f32.mrb[10].mxu1 }
 0x375   : > { %v716_v15 = vadd.f32 %v710_v9, %v665_v10  ;;  %v898_v16 = vpop.f32.mrb[11].mxu0  ;;  %v904_v17 = vpop.f32.mrb[11].mxu1 }
 0x377   : > { %v721_v19 = vadd.f32 %v719_v18, %v716_v15 }
 0x379   : > { %722 = vst.msk [vmem:[%s304_s13] sm:$0xf] %vm326_vm1, %v721_v19 }
 0x37a   : > { %1022 = shalt.err (!%p1019_p4)
}
 0x37b   : > { %s1023_s30 = scalar_lea.hbm %s1330_s8, 64  ;;  %s1027_s15 = scalar_lea.hbm %s1386_s6, 128 }
 0x37c   : > { %p1024_p10 = scmp.ne.s32.totalorder %s1330_s8, %s1023_s30  ;;  %p1028_p2 = scmp.lt.u32.totalorder %s1330_s8, %s1386_s6 }
 0x37d   : > { %p1029_p5 = scmp.lt.u32.totalorder %s1027_s15, %s1023_s30  ;;  %p1031_p8 = scmp.lt.u32.totalorder %s1023_s30, %s1330_s8 }
 0x37e   : > { %p1025_p12 = pnand %p1024_p10, %p1395_p11 }
 0x37f   : > { %p1030_p9 = por %p1029_p5, %p1028_p2 }
 0x380   : > { %p1026_p1 = pneg %p1025_p12 }
 0x381   : > { %p1032_p0 = por %p1031_p8, %p1030_p9 }
 0x383   : > { %p1033_p7 = pnand %p1032_p0, %p1026_p1 }
 0x385   : > { %1036 = shalt.err (!%p1033_p7)
}
 0x386   : > { %907 = dma.vmem_to_hbm [thread:$0]  (%p1395_p11), %s1332_s17, 64, %s1330_s8, %s724_s24  }
 0x387 PF: > { %s750_s9 = sand.u32 1, %s1071_s21   ;;  %p1396_p13 = scmp.ne.s32.totalorder %s1391_s12, 0 }
 0x388   : > { %p1397_p3 = scmp.ge.s32.totalorder %s1091_s26, 2  ;;  %s751_s19 = scalar_lea.sflag [#allocation6], %s750_s9 }
 0x38a   : > { %p914_p6 = pnand %p1397_p3, %p1396_p13 }
 0x38c   : > { %1066 = dma.done.wait (!%p914_p6), %s751_s19, 64  }
 0x38d   : > { %1068 = vsyncadd (!%p914_p6), %s751_s19, 4294967232  ;;  %s22_s26 = sadd.s32 1, %s1091_s26   ;;  %s1398_s21 = smov %s1075_s22 }
 0x38e   : > { %p19_p4 = scmp.ge.s32.totalorder %s22_s26, 4   ;;  %s1399_s22 = smov %s1079_s23 }
 0x38f   : > { %s1400_s23 = smov %s1196_s11  ;;  %s1401_s24 = smov %s1087_s25 }
 0x390   : > { %s1402_s25 = smov %s1404_s29  ;;  %21 = sbr.rel (!%p19_p4) target bundleno = 6 (0x6), region = 96 }
 0x397   :  { %756 = vsyncpa [#allocation5], 1 }
 0x398   :  { %758 = vsyncpa [#allocation5 + $0x1], 1 }
 0x399   :  { %759 = vsyncpa [#allocation6], 1 }
 0x39a   :  { %761 = vsyncpa [#allocation6 + $0x1], 1 }

</bundles_post_ra>
